<compile_context>
chip_gen: v6e
topology: v6e:2x2x1
jax: 0.10.0
libtpu: 0.0.40
codegen_flags: <defaults>
</compile_context>

<pallas_src>
import jax
import jax.numpy as jnp
from jax.experimental import pallas as pl
from jax.experimental.pallas import tpu as pltpu


def _rnn_dropout_kernel(mask_ref, x_ref, o_ref):
    # x_ref:    (TILE_B, TILE_T, D)
    # mask_ref: (TILE_B, 1, D) -- broadcast over the time (sublane) axis.
    o_ref[...] = x_ref[...] * mask_ref[...]


def _dropout_mask(seed, B, D, p, dtype):
    """Bernoulli(1-p)/(1-p) mask of shape (B, 1, D) in `dtype`."""
    key = jax.random.PRNGKey(seed)
    keep = jax.random.bernoulli(key, 1.0 - p, (B, 1, D))
    scale = jnp.asarray(1.0 / (1.0 - p), dtype)
    return jnp.where(keep, scale, jnp.zeros((), dtype)).astype(dtype)


def _sublane_multiple(itemsize):
    # Sub-32-bit dtypes pack along sublanes: f32 -> 8, bf16 -> 16, int8 -> 32.
    return max(8, 32 // max(1, itemsize))


def _vmem_budget():
    """Per-generation (target_block_bytes, vmem_limit_bytes)."""
    try:
        cap = getattr(pltpu.get_tpu_info(), "vmem_capacity_bytes", 128 << 20)
    except Exception:
        cap = 128 << 20
    if cap >= (128 << 20):
        # v5e / v6e: 128 MiB physical VMEM -> be aggressive.
        return 12 << 20, 64 << 20
    # v7x: 64 MiB physical per TC -> 2*in + 2*out blocks must fit with headroom.
    return 8 << 20, 44 << 20


def _pick_tiles(B, T, D, itemsize, target_bytes):
    """Pick (tile_b, tile_t) giving ~target_bytes contiguous blocks.

    Invariant kept: tile_b == 1 OR tile_t == T, so every (tile_b, tile_t, D)
    block is a single contiguous HBM region (one DMA descriptor).
    """
    sub = _sublane_multiple(itemsize)
    row_bytes = T * D * itemsize  # one (T, D) slab

    if row_bytes >= target_bytes:
        # One batch row per block; tile the time axis (dtype-aware sublanes).
        tile_b = 1
        tile_t = max(sub, ((target_bytes // (D * itemsize)) // sub) * sub)
        tile_t = min(tile_t, T)
        # Prefer a tile_t that divides T so the last time tile isn't ragged.
        if tile_t < T and T % tile_t != 0:
            for cand in range(tile_t, sub - 1, -sub):
                if T % cand == 0:
                    tile_t = cand
                    break
    else:
        # Whole (T, D) slab is small: pack several batch rows per block.
        tile_t = T
        tile_b = max(1, min(B, target_bytes // max(1, row_bytes)))

    # Megacore (v7x): make sure the parallel grid has >= 2 blocks so both
    # TensorCores get work. Contiguity invariant is preserved by both fixes.
    if pl.cdiv(B, tile_b) * pl.cdiv(T, tile_t) < 2:
        if B >= 2:
            tile_b = -(-B // 2)            # tile_t == T stays full -> contiguous
        elif T >= 2 * sub:
            half = -(-T // 2)
            tile_t = min(T, ((half + sub - 1) // sub) * sub)   # tile_b == 1

    return tile_b, tile_t


def rnn_dropout(x, seed, p=0.0, training=True):
    """x: (B, T, D) array.  seed: int.  Returns same shape/dtype as x."""
    if (not training) or p == 0:
        return x

    B, T, D = x.shape
    itemsize = x.dtype.itemsize
    mask = _dropout_mask(seed, B, D, float(p), x.dtype)

    # Lane-dense last dim: pad D up to a multiple of 128 if needed.
    Dp = -(-D // 128) * 128
    if Dp != D:
        x_in = jnp.pad(x, ((0, 0), (0, 0), (0, Dp - D)))
        mask_in = jnp.pad(mask, ((0, 0), (0, 0), (0, Dp - D)))
    else:
        x_in, mask_in = x, mask

    target_bytes, vmem_limit = _vmem_budget()
    tile_b, tile_t = _pick_tiles(B, T, Dp, itemsize, target_bytes)
    grid = (pl.cdiv(B, tile_b), pl.cdiv(T, tile_t))  # batch OUTER, time inner
    # (time is the inner grid axis -> the (tile_b,1,Dp) mask block index does
    #  not change across it, so the mask stays resident and is not re-DMA'd.)

    out = pl.pallas_call(
        _rnn_dropout_kernel,
        out_shape=jax.ShapeDtypeStruct((B, T, Dp), x.dtype),
        grid=grid,
        in_specs=[
            pl.BlockSpec((tile_b, 1, Dp), lambda bi, ti: (bi, 0, 0)),
            pl.BlockSpec((tile_b, tile_t, Dp), lambda bi, ti: (bi, ti, 0)),
        ],
        out_specs=pl.BlockSpec((tile_b, tile_t, Dp), lambda bi, ti: (bi, ti, 0)),
        # x (arg index 1) aliases the output: no second (B,T,D) HBM buffer.
        input_output_aliases={1: 0},
        cost_estimate=pl.CostEstimate(
            flops=B * T * Dp,
            transcendentals=0,
            bytes_accessed=(2 * B * T * Dp + B * Dp) * itemsize,
        ),
        compiler_params=pltpu.CompilerParams(
            dimension_semantics=("parallel", "parallel"),
            vmem_limit_bytes=vmem_limit,
        ),
    )(mask_in, x_in)

    if Dp != D:
        out = out[:, :, :D]
    return out


if __name__ == "__main__":
    key = jax.random.PRNGKey(0)
    B, T, D = 2, 8, 128
    p = 0.5
    seed = 42

    x = jax.random.normal(key, (B, T, D), dtype=jnp.float32)

    # Reference (same mask generator, pure-JAX broadcast multiply).
    mask = _dropout_mask(seed, B, D, p, x.dtype)
    ref = x * mask

    out = jax.block_until_ready(rnn_dropout(x, seed=seed, p=p, training=True))
    assert out.shape == x.shape and out.dtype == x.dtype
    assert jnp.allclose(out, ref, atol=1e-6), "kernel output mismatch vs reference"

    # Mask structure: shape (B, 1, D) -> constant over time; values in {0, 1/(1-p)}.
    m = mask[:, 0, :]
    assert bool(
        jnp.all(jnp.isclose(m, 0.0) | jnp.isclose(m, 1.0 / (1.0 - p)))
    ), "mask values not in {0, 1/(1-p)}"

    # bf16 path (exercises dtype-aware sublane rounding, in-dtype mask like torch).
    x_bf = x.astype(jnp.bfloat16)
    out_bf = jax.block_until_ready(rnn_dropout(x_bf, seed=seed, p=p, training=True))
    ref_bf = x_bf * _dropout_mask(seed, B, D, p, jnp.bfloat16)
    assert jnp.allclose(out_bf.astype(jnp.float32), ref_bf.astype(jnp.float32),
                        atol=1e-2), "bf16 kernel output mismatch vs reference"

    # Eval mode / p == 0 are identity.
    assert bool(jnp.all(rnn_dropout(x, seed=seed, p=p, training=False) == x))
    assert bool(jnp.all(rnn_dropout(x, seed=seed, p=0.0, training=True) == x))

    print("KERNEL_OK")
</pallas_src>

<mosaic_0001>
module attributes {stable_mosaic.version = 11 : i64} {
  func.func @_rnn_dropout_kernel(%arg0: i32, %arg1: i32, %arg2: memref<1x1x128xf32, #tpu.memory_space<vmem>>, %arg3: memref<1x8x128xf32, #tpu.memory_space<vmem>>, %arg4: memref<1x8x128xf32, #tpu.memory_space<vmem>>) attributes {dimension_semantics = [#tpu.dimension_semantics<parallel>, #tpu.dimension_semantics<parallel>], iteration_bounds = array<i64: 2, 1>, scalar_prefetch = 0 : i64, scratch_operands = 0 : i64, tpu.core_type = #tpu.core_type<tc>, window_params = [{transform_indices = @transform_0, window_bounds = array<i64: 1, 1, 128>}, {transform_indices = @transform_1, window_bounds = array<i64: 1, 8, 128>}, {transform_indices = @transform_2, window_bounds = array<i64: 1, 8, 128>}]} {
    %c0 = arith.constant 0 : index
    %c0_0 = arith.constant 0 : index
    %c0_1 = arith.constant 0 : index
    %0 = vector.load %arg3[%c0, %c0_0, %c0_1] : memref<1x8x128xf32, #tpu.memory_space<vmem>>, vector<1x8x128xf32>
    %c0_2 = arith.constant 0 : index
    %c0_3 = arith.constant 0 : index
    %c0_4 = arith.constant 0 : index
    %1 = vector.load %arg2[%c0_2, %c0_3, %c0_4] : memref<1x1x128xf32, #tpu.memory_space<vmem>>, vector<1x1x128xf32>
    %2 = vector.broadcast %1 : vector<1x1x128xf32> to vector<1x8x128xf32>
    %3 = arith.mulf %0, %2 : vector<1x8x128xf32>
    %c0_5 = arith.constant 0 : index
    %c0_6 = arith.constant 0 : index
    %c0_7 = arith.constant 0 : index
    %4 = vector.load %arg4[%c0_5, %c0_6, %c0_7] : memref<1x8x128xf32, #tpu.memory_space<vmem>>, vector<1x8x128xf32>
    tpu.vector_store %arg4[%c0_5, %c0_6, %c0_7], %3 {strides = array<i32>} : memref<1x8x128xf32, #tpu.memory_space<vmem>>, vector<1x8x128xf32>,
    return
  }
  func.func @transform_0(%arg0: i32, %arg1: i32) -> (i32, i32, i32) {
    %c0_i32 = arith.constant 0 : i32
    %c0_i32_0 = arith.constant 0 : i32
    %c0_i32_1 = arith.constant 0 : i32
    return %arg0, %c0_i32, %c0_i32_0 : i32, i32, i32
  }
  func.func @transform_1(%arg0: i32, %arg1: i32) -> (i32, i32, i32) {
    %c0_i32 = arith.constant 0 : i32
    %c0_i32_0 = arith.constant 0 : i32
    return %arg0, %arg1, %c0_i32 : i32, i32, i32
  }
  func.func @transform_2(%arg0: i32, %arg1: i32) -> (i32, i32, i32) {
    %c0_i32 = arith.constant 0 : i32
    %c0_i32_0 = arith.constant 0 : i32
    return %arg0, %arg1, %c0_i32 : i32, i32, i32
  }
}

</mosaic_0001>

<bundles_post_ra>
// kernel: tpu_custom_call.1
= control target key start
LH: loop header
LB: loop body
LE: loop exit
PB: predicated region body
PF: predicated region fallthrough
CT: control target
= control target key end

     0   :  { %7 = vsyncpa [#allocation3], 0  ;;  %s646_s0 = inlined_call_operand.vmem [shape: f32[2,1,128], index: 0, kind: input, shape index: {}]   ;;  %s647_s1 = inlined_call_operand.hbm [shape: f32[2,8,128], index: 1, kind: input, shape index: {}, may-alias: {1,2}]   ;;  %s648_s2 = inlined_call_operand.hbm [shape: f32[2,8,128], index: 2, kind: output, shape index: {}, may-alias: {1,2}]  }
   0x1   :  { %9 = vsyncpa [#allocation3 + $0x1], 0 }
   0x2   :  { %10 = vsyncpa [#allocation4], 0 }
   0x3   :  { %12 = vsyncpa [#allocation4 + $0x1], 0  ;;  %s507_s9 = smov 0   ;;  %s509_s10 = smov 0  }
   0x4   :  { %s511_s11 = smov 0   ;;  %s513_s12 = smov 0  }
   0x5   :  { %s515_s13 = smov 0   ;;  %s517_s14 = smov 0  }
   0x6 LB: > { %s304_s15 = sadd.s32 4294967295, %s488_s14   ;;  %s305_s16 = sadd.s32 4294967294, %s488_s14   ;;  %s488_s14 = sphi %s517_s14, %s18_s14   ;;  %s484_s13 = sphi %s515_s13, %s660_s13   ;;  %s480_s12 = sphi %s513_s12, %s659_s12   ;;  %s476_s11 = sphi %s511_s11, %s658_s11   ;;  %s472_s10 = sphi %s509_s10, %s657_s10   ;;  %s468_s9 = sphi %s507_s9, %s656_s9  }
   0x7   : > { %s30_s17 = sadd.s32 1, %s484_s13  ;;  %s65_s18 = sadd.s32 1, %s476_s11 }
   0x8   : > { %p32_p0 = scmp.ge.s32.totalorder %s30_s17, 2  ;;  %p72_p1 = scmp.ne.s32.totalorder %s476_s11, %s472_s10 }
   0x9   : > { %p73_p2 = scmp.eq.s32.totalorder %s488_s14, 0  ;;  %p78_p3 = scmp.ne.s32.totalorder %s472_s10, %s468_s9 }
   0xa   : > { %s662_s17 = smov (%p32_p0, %s30_s17), 0  ;;  %p79_p5 = scmp.eq.s32.totalorder %s304_s15, 0 }
   0xb   : > { %p548_p4 = por %p73_p2, %p72_p1  ;;  %s60_s20 = ssub.s32 %s484_s13, %s662_s17 }
   0xc   : > { %p104_p6 = scmp.eq.s32.totalorder %s304_s15, 1  ;;  %p63_p7 = scmp.eq.s32.totalorder %s60_s20, 0 }
   0xd   : > { %p554_p8 = por %p79_p5, %p78_p3  ;;  %p110_p10 = scmp.eq.s32.totalorder %s305_s16, 1 }
   0xe   : > { %p558_p9 = por %p104_p6, %p72_p1  ;;  %p330_p13 = scmp.lt.s32.totalorder %s488_s14, 2 }
   0xf   : > { %s563_s23 = scalar_select %p63_p7, %s476_s11, %s65_s18  }
  0x10   : > { %p565_p11 = por %p110_p10, %p78_p3  ;;  %s136_s25 = sand.u32 1, %s476_s11  }
  0x11   : > { %s308_s26 = sshll.u32 %s136_s25, 3  ;;  %s309_s27 = sshll.u32 %s484_s13, 7 }
  0x12   : > { %s652_s24 = scalar_select %p565_p11, 1, 0 }
  0x13   : > { %s146_s30 = scalar_lea.hbm %s647_s1, %s309_s27  ;;  %s140_s3 = scalar_lea.vmem [#allocation2], %s308_s26 }
  0x14   : > { %s148_s4 = sshll.u32 %s140_s3, 4  ;;  %p578_p0 = pnand %p330_p13, %p548_p4  ;;  %s149_s4 = int_to_ptr.vmem [resolvable:$true] %s148_s4 }
  0x15   : > { %p310_p1 = scmp.ge.s32.totalorder %s488_s14, 1  ;;  %p153_p2 = scmp.lt.s32.totalorder %s488_s14, 3 }
  0x16   : > { %s137_s6 = scalar_lea.sflag [#allocation3], %s136_s25  ;;  %p382_p3 = pneg %p578_p0 }
  0x17   : > { %s393_s7 = scalar_lea.vmem %s149_s4, 128  ;;  %s490_s8 = smov [#allocation2]  }
  0x18   : > { %p394_p5 = scmp.ne.s32.totalorder %s149_s4, %s393_s7  ;;  %s398_s15 = sshll.u32 %s490_s8, 4  ;;  %s399_s15 = int_to_ptr.vmem [resolvable:$false] %s398_s15 }
  0x19   : > { %s400_s16 = scalar_lea.vmem %s399_s15, 256  ;;  %p401_p10 = scmp.lt.s32.totalorder %s149_s4, %s399_s15 }
  0x1a   : > { %p396_p6 = pnand %p394_p5, %p382_p3  ;;  %p402_p12 = scmp.lt.s32.totalorder %s400_s16, %s393_s7 }
  0x1c   : > { %p397_p7 = pneg %p396_p6  ;;  %p403_p4 = por %p402_p12, %p401_p10 }
  0x1e   : > { %p404_p13 = pnand %p403_p4, %p397_p7 }
  0x20   : > { %407 = shalt.err (!%p404_p13)
}
  0x21   : > { %325 = dma.hbm_to_vmem [thread:$0]  (!%p578_p0), %s146_s30, 128, %s149_s4, %s137_s6  }
  0x22   : > { %p154_p11 = pnand %p310_p1, %p153_p2 }
  0x23   : > { %s593_s18 = sand.u32 (!%p154_p11), 1, %s472_s10  }
  0x24   : > { %157 = sbr.rel (%p154_p11) target bundleno = 68 (0x44), region = 28  ;;  %s311_s19 = sshll.u32 (!%p154_p11), %s593_s18, 3 }
  0x25   : > { %s160_s20 = scalar_lea.sflag (!%p154_p11), [#allocation3], %s593_s18  ;;  %s163_s25 = scalar_lea.vmem (!%p154_p11), [#allocation2], %s311_s19 }
  0x29   : > { %459 = dma.done.wait (%p554_p8), %s160_s20, 128  }
  0x2a   : > { %461 = vsyncadd (%p554_p8), %s160_s20, 4294967168  ;;  %p187_p11 = scmp.lt.s32.totalorder %s480_s12, 1  ;;  %s186_s30 = scalar_lea.vmem [#allocation5], %s311_s19  ;;  %v190_v0 = vld [vmem:[%s163_s25] sm:$0xff] }
  0x2b   : > { %s215_s3 = sshll.u32 %s186_s30, 4  ;;  %s315_s4 = sshll.u32 %s480_s12, 7  ;;  %s216_s3 = int_to_ptr.vmem [resolvable:$true] %s215_s3 }
  0x2c   : > { %s188_s26 = scalar_select %p187_p11, %s480_s12, 1 }
  0x2d   : > { %s213_s6 = scalar_lea.hbm %s648_s2, %s315_s4  ;;  %s201_s7 = scalar_lea.sflag [#allocation4], %s593_s18 }
  0x2e   : > { %s189_s29 = scalar_lea.vmem %s646_s0, %s188_s26  ;;  %s408_s8 = scalar_lea.vmem %s216_s3, 128 }
  0x2f   : > { %v313_v1 = vld [vmem:[%s189_s29] ss:$0 sm:$0xff]  ;;  %p409_p8 = scmp.ne.s32.totalorder %s216_s3, %s408_s8  ;;  %s491_s15 = smov [#allocation5]  }
  0x30   : > { %v198_v2 = vmul.f32 %v313_v1, %v190_v0  ;;  %s412_s16 = sshll.u32 %s491_s15, 4  ;;  %s413_s16 = int_to_ptr.vmem [resolvable:$false] %s412_s16 }
  0x31   : > { %p410_p12 = pnand %p409_p8, %p558_p9  ;;  %s414_s19 = scalar_lea.vmem %s413_s16, 256 }
  0x32   : > { %199 = vst [vmem:[%s186_s30] sm:$0xff] %v198_v2  ;;  %p415_p1 = scmp.lt.s32.totalorder %s216_s3, %s413_s16  ;;  %p416_p2 = scmp.lt.s32.totalorder %s414_s19, %s408_s8 }
  0x33   : > { %p411_p0 = pneg %p410_p12 }
  0x34   : > { %p417_p3 = por %p416_p2, %p415_p1 }
  0x36   : > { %p418_p5 = pnand %p417_p3, %p411_p0 }
  0x38   : > { %421 = shalt.err (!%p418_p5)
}
  0x39   : > { %s422_s12 = scalar_lea.hbm %s213_s6, 128  ;;  %s426_s25 = scalar_lea.hbm %s648_s2, 256 }
  0x3a   : > { %p423_p6 = scmp.ne.s32.totalorder %s213_s6, %s422_s12  ;;  %p427_p4 = scmp.lt.s32.totalorder %s213_s6, %s648_s2 }
  0x3b   : > { %p428_p13 = scmp.lt.s32.totalorder %s426_s25, %s422_s12 }
  0x3c   : > { %p424_p7 = pnand %p423_p6, %p558_p9 }
  0x3d   : > { %p429_p11 = por %p428_p13, %p427_p4 }
  0x3e   : > { %p425_p10 = pneg %p424_p7 }
  0x40   : > { %p430_p8 = pnand %p429_p11, %p425_p10 }
  0x42   : > { %433 = shalt.err (!%p430_p8)
}
  0x43   : > { %320 = dma.vmem_to_hbm [thread:$0]  (%p558_p9), %s216_s3, 128, %s213_s6, %s201_s7  }
  0x44 PF: > { %s227_s28 = sand.u32 1, %s468_s9   ;;  %p654_p12 = scmp.ne.s32.totalorder %s652_s24, 0 }
  0x45   : > { %p655_p0 = scmp.ge.s32.totalorder %s488_s14, 2  ;;  %s228_s29 = scalar_lea.sflag [#allocation4], %s227_s28 }
  0x47   : > { %p327_p1 = pnand %p655_p0, %p654_p12 }
  0x49   : > { %p328_p2 = pneg %p327_p1 }
  0x4b   : > { %463 = dma.done.wait (%p328_p2), %s228_s29, 128  }
  0x4c   : > { %465 = vsyncadd (%p328_p2), %s228_s29, 4294967168  ;;  %s18_s14 = sadd.s32 1, %s488_s14   ;;  %s656_s9 = smov %s472_s10 }
  0x4d   : > { %p15_p3 = scmp.ge.s32.totalorder %s18_s14, 4   ;;  %s657_s10 = smov %s476_s11 }
  0x4e   : > { %s658_s11 = smov %s563_s23  ;;  %s659_s12 = smov %s484_s13 }
  0x4f   : > { %s660_s13 = smov %s662_s17  ;;  %17 = sbr.rel (!%p15_p3) target bundleno = 6 (0x6), region = 76 }
  0x54   :  { %233 = vsyncpa [#allocation3], 1 }
  0x55   :  { %235 = vsyncpa [#allocation3 + $0x1], 1 }
  0x56   :  { %236 = vsyncpa [#allocation4], 1 }
  0x57   :  { %238 = vsyncpa [#allocation4 + $0x1], 1 }

</bundles_post_ra>
